<compile_context>
chip_gen: v6e
topology: v6e:2x2x1
jax: 0.10.0
libtpu: 0.0.40
codegen_flags: <defaults>
</compile_context>

<pallas_src>
import functools

import jax
import jax.numpy as jnp
from jax.experimental import pallas as pl
from jax.experimental.pallas import tpu as pltpu


def _roundup(x, m):
    return ((x + m - 1) // m) * m


def _conv_matmul_kernel(p_ref, w_ref, b_ref, o_ref, acc_ref):
    # p_ref: (tm, tk) bf16 im2col patch tile
    # w_ref: (tk, to) bf16 flattened conv-weight tile
    # b_ref: (1, to)  f32 bias tile
    # o_ref: (tm, to) f32 output tile
    # acc_ref: (tm, to) f32 accumulator scratch (persists across the K axis)
    kk = pl.program_id(2)

    @pl.when(kk == 0)
    def _():
        acc_ref[...] = jnp.zeros_like(acc_ref)

    acc_ref[...] += jnp.dot(p_ref[...], w_ref[...],
                            preferred_element_type=jnp.float32)

    @pl.when(kk == pl.num_programs(2) - 1)
    def _():
        o_ref[...] = (acc_ref[...] + b_ref[...]).astype(o_ref.dtype)


def _pallas_conv_matmul(patches, w2d, bias2d, *, tm, to, tk):
    Mp, Kp = patches.shape
    _, Op = w2d.shape
    grid = (Mp // tm, Op // to, Kp // tk)

    # Explicit scoped-VMEM budget from the double-buffered per-step footprint.
    step_bytes = (2 * tm * tk * patches.dtype.itemsize      # patch tiles
                  + 2 * tk * to * w2d.dtype.itemsize        # weight tiles
                  + 2 * to * bias2d.dtype.itemsize          # bias tiles
                  + 2 * tm * to * 4                         # f32 output tiles
                  + tm * to * 4)                            # f32 accumulator
    vmem_limit = int(min(max(4 * step_bytes, 32 * 1024 * 1024),
                         64 * 1024 * 1024))

    cost = pl.CostEstimate(
        flops=2 * Mp * Kp * Op,
        transcendentals=0,
        bytes_accessed=(patches.size * patches.dtype.itemsize
                        + (Mp // tm) * w2d.size * w2d.dtype.itemsize
                        + Mp * Op * 4))

    return pl.pallas_call(
        _conv_matmul_kernel,
        out_shape=jax.ShapeDtypeStruct((Mp, Op), jnp.float32),
        grid_spec=pltpu.PrefetchScalarGridSpec(
            num_scalar_prefetch=0,
            grid=grid,
            in_specs=[
                pl.BlockSpec((tm, tk), lambda i, j, kk: (i, kk)),  # patches
                pl.BlockSpec((tk, to), lambda i, j, kk: (kk, j)),  # weights
                pl.BlockSpec((1, to), lambda i, j, kk: (0, j)),    # bias
            ],
            out_specs=pl.BlockSpec((tm, to), lambda i, j, kk: (i, j)),
            scratch_shapes=[pltpu.VMEM((tm, to), jnp.float32)],
        ),
        compiler_params=pltpu.CompilerParams(
            dimension_semantics=("parallel", "parallel", "arbitrary"),
            vmem_limit_bytes=vmem_limit),
        cost_estimate=cost,
    )(patches, w2d, bias2d)


@functools.partial(jax.jit, static_argnames=("kernel_size", "stride"))
def conv_layer_forward(x, weight, bias, *, kernel_size, stride):
    """Forward of PyTorch ConvLayer: ReflectionPad2d(k//2) -> Conv2d(k, stride).

    x:      (N, C, H, W)   float32  (NCHW, same as PyTorch)
    weight: (O, C, k, k)   float32  (same as nn.Conv2d.weight)
    bias:   (O,)           float32
    returns (N, O, H_out, W_out) float32
    """
    N, C, H, W = x.shape
    O = weight.shape[0]
    k = kernel_size
    p = k // 2

    # NHWC internally (channels on the lane axis); cast to bf16 before any
    # large copy so the reflection pad / im2col move half the bytes.
    x_nhwc = x.astype(jnp.bfloat16).transpose(0, 2, 3, 1)
    xp = jnp.pad(x_nhwc, ((0, 0), (p, p), (p, p), (0, 0)), mode="reflect")
    Hp, Wp = H + 2 * p, W + 2 * p
    H_out = (Hp - k) // stride + 1
    W_out = (Wp - k) // stride + 1

    # im2col in NHWC; K flattened as (kh, kw, c).
    # TODO(synk): fuse this expansion into the kernel (see header note).
    cols = []
    for kh in range(k):
        for kw in range(k):
            cols.append(
                xp[:, kh:kh + (H_out - 1) * stride + 1:stride,
                      kw:kw + (W_out - 1) * stride + 1:stride, :])
    patches = jnp.stack(cols, axis=3).reshape(N * H_out * W_out, k * k * C)

    # Weight flattened to match the (kh, kw, c) K ordering; bias as an f32 row.
    w2d = weight.astype(jnp.bfloat16).transpose(2, 3, 1, 0).reshape(k * k * C, O)
    b2d = bias.astype(jnp.float32).reshape(1, O)

    M, K = patches.shape

    # Tile selection (bf16 inputs, f32 accumulate). K is tiled so the VMEM
    # footprint is bounded regardless of C and kernel size.
    tm = min(512, _roundup(M, 16))
    if K <= 512:
        tk, K_pad = K, K            # full-dim block: no K padding pass at all
    else:
        tk = 512
        K_pad = _roundup(K, tk)
    O_pad = _roundup(O, 128)
    to = 256 if O_pad % 256 == 0 else 128
    to = min(to, O_pad)
    M_pad = _roundup(M, tm)

    if (M_pad, K_pad) != (M, K):
        patches = jnp.pad(patches, ((0, M_pad - M), (0, K_pad - K)))
    if (K_pad, O_pad) != (K, O):
        w2d = jnp.pad(w2d, ((0, K_pad - K), (0, O_pad - O)))
    if O_pad != O:
        b2d = jnp.pad(b2d, ((0, 0), (0, O_pad - O)))

    out = _pallas_conv_matmul(patches, w2d, b2d, tm=tm, to=to, tk=tk)
    out = out[:M, :O].reshape(N, H_out, W_out, O).transpose(0, 3, 1, 2)  # NCHW
    return out


if __name__ == "__main__":
    # Small shapes consistent with the module.
    N, C, H, W = 2, 4, 16, 16
    O, k, stride = 8, 3, 1

    key = jax.random.PRNGKey(0)
    kx, kwk, kb = jax.random.split(key, 3)
    x = jax.random.normal(kx, (N, C, H, W), dtype=jnp.float32)
    fan_in = C * k * k
    bound = 1.0 / (fan_in ** 0.5)
    weight = jax.random.uniform(kwk, (O, C, k, k), jnp.float32, -bound, bound)
    bias = jax.random.uniform(kb, (O,), jnp.float32, -bound, bound)

    out = conv_layer_forward(x, weight, bias, kernel_size=k, stride=stride)
    out = jax.block_until_ready(out)

    # f32 reference: reflection pad -> VALID conv -> bias.
    p = k // 2
    xp = jnp.pad(x, ((0, 0), (0, 0), (p, p), (p, p)), mode="reflect")
    ref = jax.lax.conv_general_dilated(
        xp, weight, window_strides=(stride, stride), padding="VALID",
        dimension_numbers=("NCHW", "OIHW", "NCHW"))
    ref = ref + bias[None, :, None, None]
    ref = jax.block_until_ready(ref)

    assert out.shape == ref.shape, (out.shape, ref.shape)
    # bf16 MXU inputs (f32 accumulation): compare with a relative tolerance.
    err = float(jnp.max(jnp.abs(out - ref)))
    scale = float(jnp.max(jnp.abs(ref)))
    assert err <= 3e-2 * scale + 1e-5, (err, scale)

    print("KERNEL_OK")
</pallas_src>

<mosaic_0001>
module attributes {stable_mosaic.version = 11 : i64} {
  func.func @_conv_matmul_kernel(%arg0: i32, %arg1: i32, %arg2: i32, %arg3: memref<512x36xbf16, #tpu.memory_space<vmem>>, %arg4: memref<36x128xbf16, #tpu.memory_space<vmem>>, %arg5: memref<1x128xf32, #tpu.memory_space<vmem>>, %arg6: memref<512x128xf32, #tpu.memory_space<vmem>>, %arg7: memref<512x128xf32, #tpu.memory_space<vmem>>) attributes {dimension_semantics = [#tpu.dimension_semantics<parallel>, #tpu.dimension_semantics<parallel>, #tpu.dimension_semantics<arbitrary>], iteration_bounds = array<i64: 1, 1, 1>, scalar_prefetch = 0 : i64, scratch_operands = 1 : i64, tpu.core_type = #tpu.core_type<tc>, window_params = [{transform_indices = @transform_0, window_bounds = array<i64: 512, 36>}, {transform_indices = @transform_1, window_bounds = array<i64: 36, 128>}, {transform_indices = @transform_2, window_bounds = array<i64: 1, 128>}, {transform_indices = @transform_3, window_bounds = array<i64: 512, 128>}]} {
    %c0_i32 = arith.constant 0 : i32
    %0 = arith.cmpi eq, %arg2, %c0_i32 : i32
    %1 = arith.extui %0 : i1 to i32
    %c0_i32_0 = arith.constant 0 : i32
    %2 = arith.cmpi ne, %1, %c0_i32_0 : i32
    scf.if %2 {
      %cst_10 = arith.constant 0.000000e+00 : f32
      %12 = vector.broadcast %cst_10 : f32 to vector<512x128xf32>
      %c0_11 = arith.constant 0 : index
      %c0_12 = arith.constant 0 : index
      %13 = vector.load %arg7[%c0_11, %c0_12] : memref<512x128xf32, #tpu.memory_space<vmem>>, vector<512x128xf32>
      tpu.vector_store %arg7[%c0_11, %c0_12], %12 {strides = array<i32>} : memref<512x128xf32, #tpu.memory_space<vmem>>, vector<512x128xf32>,
    } else {
    }
    %c0 = arith.constant 0 : index
    %c0_1 = arith.constant 0 : index
    %3 = vector.load %arg7[%c0, %c0_1] : memref<512x128xf32, #tpu.memory_space<vmem>>, vector<512x128xf32>
    %c0_2 = arith.constant 0 : index
    %c0_3 = arith.constant 0 : index
    %4 = vector.load %arg3[%c0_2, %c0_3] : memref<512x36xbf16, #tpu.memory_space<vmem>>, vector<512x36xbf16>
    %c0_4 = arith.constant 0 : index
    %c0_5 = arith.constant 0 : index
    %5 = vector.load %arg4[%c0_4, %c0_5] : memref<36x128xbf16, #tpu.memory_space<vmem>>, vector<36x128xbf16>
    %cst = arith.constant dense<0.000000e+00> : vector<512x128xf32>
    %6 = tpu.matmul %4, %5, %cst {dimension_numbers = #tpu.dot_dimension_numbers<[1], [0], [0], [1], [0, 0, 1, 1], [], []>} : vector<512x36xbf16>, vector<36x128xbf16>, vector<512x128xf32> -> vector<512x128xf32>
    %7 = arith.addf %3, %6 : vector<512x128xf32>
    %c0_6 = arith.constant 0 : index
    %c0_7 = arith.constant 0 : index
    %8 = vector.load %arg7[%c0_6, %c0_7] : memref<512x128xf32, #tpu.memory_space<vmem>>, vector<512x128xf32>
    tpu.vector_store %arg7[%c0_6, %c0_7], %7 {strides = array<i32>} : memref<512x128xf32, #tpu.memory_space<vmem>>, vector<512x128xf32>,
    %c0_i32_8 = arith.constant 0 : i32
    %9 = arith.cmpi eq, %arg2, %c0_i32_8 : i32
    %10 = arith.extui %9 : i1 to i32
    %c0_i32_9 = arith.constant 0 : i32
    %11 = arith.cmpi ne, %10, %c0_i32_9 : i32
    scf.if %11 {
      %c0_10 = arith.constant 0 : index
      %c0_11 = arith.constant 0 : index
      %12 = vector.load %arg7[%c0_10, %c0_11] : memref<512x128xf32, #tpu.memory_space<vmem>>, vector<512x128xf32>
      %c0_12 = arith.constant 0 : index
      %c0_13 = arith.constant 0 : index
      %13 = vector.load %arg5[%c0_12, %c0_13] : memref<1x128xf32, #tpu.memory_space<vmem>>, vector<1x128xf32>
      %14 = vector.broadcast %13 : vector<1x128xf32> to vector<512x128xf32>
      %15 = arith.addf %12, %14 : vector<512x128xf32>
      %c0_14 = arith.constant 0 : index
      %c0_15 = arith.constant 0 : index
      %16 = vector.load %arg6[%c0_14, %c0_15] : memref<512x128xf32, #tpu.memory_space<vmem>>, vector<512x128xf32>
      tpu.vector_store %arg6[%c0_14, %c0_15], %15 {strides = array<i32>} : memref<512x128xf32, #tpu.memory_space<vmem>>, vector<512x128xf32>,
    } else {
    }
    return
  }
  func.func @transform_0(%arg0: i32, %arg1: i32, %arg2: i32) -> (i32, i32) {
    %c0_i32 = arith.constant 0 : i32
    return %arg0, %arg2 : i32, i32
  }
  func.func @transform_1(%arg0: i32, %arg1: i32, %arg2: i32) -> (i32, i32) {
    %c0_i32 = arith.constant 0 : i32
    return %arg2, %arg1 : i32, i32
  }
  func.func @transform_2(%arg0: i32, %arg1: i32, %arg2: i32) -> (i32, i32) {
    %c0_i32 = arith.constant 0 : i32
    %c0_i32_0 = arith.constant 0 : i32
    return %c0_i32, %arg1 : i32, i32
  }
  func.func @transform_3(%arg0: i32, %arg1: i32, %arg2: i32) -> (i32, i32) {
    %c0_i32 = arith.constant 0 : i32
    return %arg0, %arg1 : i32, i32
  }
}

</mosaic_0001>

<bundles_post_ra>
// kernel: conv_layer_forward.1
= control target key start
LH: loop header
LB: loop body
LE: loop exit
PB: predicated region body
PF: predicated region fallthrough
CT: control target
= control target key end

     0   :  { %vm488_vm0 = vcmask 1041408   ;;  %vm391_vm1 = vcmask 293888   ;;  %s1749_s1 = inlined_call_operand.vmem [shape: bf16[36,128], index: 1, kind: input, shape index: {}]   ;;  %s1750_s0 = inlined_call_operand.vmem [shape: bf16[512,36], index: 0, kind: input, shape index: {}]   ;;  %s1751_s2 = inlined_call_operand.vmem [shape: f32[1,128], index: 2, kind: input, shape index: {}]   ;;  %s1752_s3 = inlined_call_operand.vmem [shape: f32[512,128], index: 3, kind: output, shape index: {}]  }
   0x1   :  { %v1296_v0 = vld [vmem:[%s1749_s1 + $0x10] ss:$0 sps:$4 sm:$0x33]   ;;  %v1297_v1 = vld [vmem:[%s1749_s1 + $0x8] sm:$0xff]   ;;  %v1298_v3 = vld [vmem:[%s1749_s1] sm:$0xff]  }
   0x2   :  { %1294 = vmatprep.subr.msk.bf16.mxu0 %vm488_vm0, %v1296_v0  ;;  %1295 = vmatprep.subr.msk.bf16.mxu1 %vm488_vm0, %v1296_v0  ;;  %v490_v2 = vsel %vm488_vm0, %v1296_v0, 0  ;;  %v1299_v4 = vld [vmem:[%s1750_s0] sm:$0xff]   ;;  %v1301_v6 = vld [vmem:[%s1750_s0 + $0x8] sm:$0xff]   ;;  %v1303_v8 = vld [vmem:[%s1750_s0 + $0x10] sm:$0xff]  }
   0x3   :  { %1219 = vmatpush3.bf16.msra.mxu0 %v490_v2  ;;  %1291 = vmatpush3.bf16.msra.mxu1 %v490_v2  ;;  %v1300_v5 = vld [vmem:[%s1750_s0 + $0x80] sm:$0xff]   ;;  %v1302_v7 = vld [vmem:[%s1750_s0 + $0x88] sm:$0xff]   ;;  %v1304_v9 = vld [vmem:[%s1750_s0 + $0x90] sm:$0xff]  }
   0x4   :  { %1220 = vmatprep.subr.bf16.mxu0 %v1297_v1  ;;  %1289 = vmatprep.subr.bf16.mxu1 %v1297_v1  ;;  %v1305_v10 = vld [vmem:[%s1750_s0 + $0x18] sm:$0xff]   ;;  %v1307_v12 = vld [vmem:[%s1750_s0 + $0x20] sm:$0xff]   ;;  %v1309_v14 = vld [vmem:[%s1750_s0 + $0x28] sm:$0xff]  }
   0x5   :  { %1224 = vmatprep.mubr.msk.bf16.mxu0 %vm391_vm1, %v1299_v4  ;;  %1256 = vmatprep.mubr.msk.bf16.mxu1 %vm391_vm1, %v1300_v5  ;;  %v1306_v11 = vld [vmem:[%s1750_s0 + $0x98] sm:$0xff]   ;;  %v1308_v13 = vld [vmem:[%s1750_s0 + $0xa0] sm:$0xff]   ;;  %v1310_v15 = vld [vmem:[%s1750_s0 + $0xa8] sm:$0xff]  }
   0x6   :  { %v1311_v16 = vld [vmem:[%s1750_s0 + $0x30] sm:$0xff]   ;;  %v1313_v18 = vld [vmem:[%s1750_s0 + $0x38] sm:$0xff]   ;;  %v1315_v20 = vld [vmem:[%s1750_s0 + $0x40] sm:$0xff]  }
   0x7   :  { %1221 = vmatpush3.bf16.msra.mxu0 %v1297_v1  ;;  %1292 = vmatpush3.bf16.msra.mxu1 %v1297_v1  ;;  %v1312_v17 = vld [vmem:[%s1750_s0 + $0xb0] sm:$0xff]   ;;  %v1314_v19 = vld [vmem:[%s1750_s0 + $0xb8] sm:$0xff]   ;;  %v1316_v21 = vld [vmem:[%s1750_s0 + $0xc0] sm:$0xff]  }
   0x8   :  { %1222 = vmatprep.subr.bf16.mxu0 %v1298_v3  ;;  %1290 = vmatprep.subr.bf16.mxu1 %v1298_v3  ;;  %v1317_v22 = vld [vmem:[%s1750_s0 + $0x48] sm:$0xff]   ;;  %v1319_v24 = vld [vmem:[%s1750_s0 + $0x50] sm:$0xff]   ;;  %v1321_v26 = vld [vmem:[%s1750_s0 + $0x58] sm:$0xff]  }
   0x9   :  { %v1318_v23 = vld [vmem:[%s1750_s0 + $0xc8] sm:$0xff]   ;;  %v1320_v25 = vld [vmem:[%s1750_s0 + $0xd0] sm:$0xff]   ;;  %v1322_v27 = vld [vmem:[%s1750_s0 + $0xd8] sm:$0xff]  }
   0xa   :  { %v1323_v28 = vld [vmem:[%s1750_s0 + $0x60] sm:$0xff]   ;;  %v1325_v30 = vld [vmem:[%s1750_s0 + $0x68] sm:$0xff]   ;;  %v1327_v32 = vld [vmem:[%s1750_s0 + $0x70] sm:$0xff]  }
   0xb   :  { %1223 = vmatpush3.bf16.msra.mxu0 %v1298_v3  ;;  %1293 = vmatpush3.bf16.msra.mxu1 %v1298_v3  ;;  %v1324_v29 = vld [vmem:[%s1750_s0 + $0xe0] sm:$0xff]   ;;  %v1326_v31 = vld [vmem:[%s1750_s0 + $0xe8] sm:$0xff]   ;;  %v1328_v33 = vld [vmem:[%s1750_s0 + $0xf0] sm:$0xff]  }
   0xc   :  { %v1329_v34 = vld [vmem:[%s1750_s0 + $0x78] sm:$0xff]   ;;  %v1491_v36 = vld [vmem:[%s1751_s2] ss:$0 sm:$0xff] }
   0xd   :  { %v1330_v35 = vld [vmem:[%s1750_s0 + $0xf8] sm:$0xff]  }
   0xe   :  { %1225 = vmatmul.mubr.msk.bf16.vlgmr.msra.gmra.mxu0 %vm391_vm1, %v1301_v6  ;;  %1257 = vmatmul.mubr.msk.bf16.vlgmr.msra.gmra.mxu1 %vm391_vm1, %v1302_v7 }
   0xf   :  { %1228 = vmatprep.mubr.msk.bf16.mxu0 %vm391_vm1, %v1303_v8  ;;  %1260 = vmatprep.mubr.msk.bf16.mxu1 %vm391_vm1, %v1304_v9 }
  0x16   :  { %1229 = vmatmul.mubr.msk.bf16.gmra.mxu0 %vm391_vm1, %v1305_v10  ;;  %1261 = vmatmul.mubr.msk.bf16.gmra.mxu1 %vm391_vm1, %v1306_v11 }
  0x17   :  { %1232 = vmatprep.mubr.msk.bf16.mxu0 %vm391_vm1, %v1307_v12  ;;  %1264 = vmatprep.mubr.msk.bf16.mxu1 %vm391_vm1, %v1308_v13 }
  0x1e   :  { %1233 = vmatmul.mubr.msk.bf16.gmra.mxu0 %vm391_vm1, %v1309_v14  ;;  %1265 = vmatmul.mubr.msk.bf16.gmra.mxu1 %vm391_vm1, %v1310_v15 }
  0x1f   :  { %1236 = vmatprep.mubr.msk.bf16.mxu0 %vm391_vm1, %v1311_v16  ;;  %1268 = vmatprep.mubr.msk.bf16.mxu1 %vm391_vm1, %v1312_v17 }
  0x26   :  { %1237 = vmatmul.mubr.msk.bf16.gmra.mxu0 %vm391_vm1, %v1313_v18  ;;  %1269 = vmatmul.mubr.msk.bf16.gmra.mxu1 %vm391_vm1, %v1314_v19 }
  0x27   :  { %1240 = vmatprep.mubr.msk.bf16.mxu0 %vm391_vm1, %v1315_v20  ;;  %1272 = vmatprep.mubr.msk.bf16.mxu1 %vm391_vm1, %v1316_v21 }
  0x2e   :  { %1241 = vmatmul.mubr.msk.bf16.gmra.mxu0 %vm391_vm1, %v1317_v22  ;;  %1273 = vmatmul.mubr.msk.bf16.gmra.mxu1 %vm391_vm1, %v1318_v23 }
  0x2f   :  { %1244 = vmatprep.mubr.msk.bf16.mxu0 %vm391_vm1, %v1319_v24  ;;  %1276 = vmatprep.mubr.msk.bf16.mxu1 %vm391_vm1, %v1320_v25 }
  0x36   :  { %1245 = vmatmul.mubr.msk.bf16.gmra.mxu0 %vm391_vm1, %v1321_v26  ;;  %1277 = vmatmul.mubr.msk.bf16.gmra.mxu1 %vm391_vm1, %v1322_v27 }
  0x37   :  { %1248 = vmatprep.mubr.msk.bf16.mxu0 %vm391_vm1, %v1323_v28  ;;  %1280 = vmatprep.mubr.msk.bf16.mxu1 %vm391_vm1, %v1324_v29 }
  0x3e   :  { %1249 = vmatmul.mubr.msk.bf16.gmra.mxu0 %vm391_vm1, %v1325_v30  ;;  %1281 = vmatmul.mubr.msk.bf16.gmra.mxu1 %vm391_vm1, %v1326_v31 }
  0x3f   :  { %1252 = vmatprep.mubr.msk.bf16.mxu0 %vm391_vm1, %v1327_v32  ;;  %1284 = vmatprep.mubr.msk.bf16.mxu1 %vm391_vm1, %v1328_v33 }
  0x46   :  { %1253 = vmatmul.mubr.msk.bf16.gmra.mxu0 %vm391_vm1, %v1329_v34  ;;  %1285 = vmatmul.mubr.msk.bf16.gmra.mxu1 %vm391_vm1, %v1330_v35 }
  0xce   :  { %v1226_v37 = vpop.f32.mrf.mxu0  ;;  %v1258_v38 = vpop.f32.mrf.mxu1 }
  0xcf   :  { %v985_v39 = vadd.f32 %v1226_v37, %v1491_v36  ;;  %v1017_v40 = vadd.f32 %v1258_v38, %v1491_v36 }
  0xd0   :  { %v526_v41 = vpop.f32.mrf.mxu0  ;;  %v654_v42 = vpop.f32.mrf.mxu1 }
  0xd1   :  { %1049 = vst [vmem:[%s1752_s3 + $0x10] sm:$0xff] %v985_v39  ;;  %1081 = vst [vmem:[%s1752_s3 + $0x110] sm:$0xff] %v1017_v40  ;;  %v983_v43 = vadd.f32 %v1491_v36, %v526_v41  ;;  %v1015_v44 = vadd.f32 %v1491_v36, %v654_v42 }
  0xd2   :  { %v1227_v45 = vpop.f32.mrf.mxu0  ;;  %v1259_v46 = vpop.f32.mrf.mxu1 }
  0xd3   :  { %1047 = vst [vmem:[%s1752_s3] sm:$0xff] %v983_v43  ;;  %1079 = vst [vmem:[%s1752_s3 + $0x100] sm:$0xff] %v1015_v44  ;;  %v986_v47 = vadd.f32 %v1227_v45, %v1491_v36  ;;  %v1018_v48 = vadd.f32 %v1259_v46, %v1491_v36 }
  0xd4   :  { %v529_v49 = vpop.f32.mrf.mxu0  ;;  %v657_v50 = vpop.f32.mrf.mxu1 }
  0xd5   :  { %1050 = vst [vmem:[%s1752_s3 + $0x18] sm:$0xff] %v986_v47  ;;  %1082 = vst [vmem:[%s1752_s3 + $0x118] sm:$0xff] %v1018_v48  ;;  %v984_v51 = vadd.f32 %v1491_v36, %v529_v49  ;;  %v1016_v52 = vadd.f32 %v1491_v36, %v657_v50 }
  0xd6   :  { %v1230_v53 = vpop.f32.mrf.mxu0  ;;  %v1262_v54 = vpop.f32.mrf.mxu1 }
  0xd7   :  { %1048 = vst [vmem:[%s1752_s3 + $0x8] sm:$0xff] %v984_v51  ;;  %1080 = vst [vmem:[%s1752_s3 + $0x108] sm:$0xff] %v1016_v52  ;;  %v989_v55 = vadd.f32 %v1230_v53, %v1491_v36  ;;  %v1021_v56 = vadd.f32 %v1262_v54, %v1491_v36 }
  0xd8   :  { %v542_v57 = vpop.f32.mrf.mxu0  ;;  %v670_v58 = vpop.f32.mrf.mxu1 }
  0xd9   :  { %1053 = vst [vmem:[%s1752_s3 + $0x30] sm:$0xff] %v989_v55  ;;  %1085 = vst [vmem:[%s1752_s3 + $0x130] sm:$0xff] %v1021_v56  ;;  %v987_v59 = vadd.f32 %v1491_v36, %v542_v57  ;;  %v1019_v60 = vadd.f32 %v1491_v36, %v670_v58 }
  0xda   :  { %v1231_v61 = vpop.f32.mrf.mxu0  ;;  %v1263_v62 = vpop.f32.mrf.mxu1 }
  0xdb   :  { %1051 = vst [vmem:[%s1752_s3 + $0x20] sm:$0xff] %v987_v59  ;;  %1083 = vst [vmem:[%s1752_s3 + $0x120] sm:$0xff] %v1019_v60  ;;  %v990_v63 = vadd.f32 %v1231_v61, %v1491_v36  ;;  %v1022_v0 = vadd.f32 %v1263_v62, %v1491_v36 }
  0xdc   :  { %v545_v1 = vpop.f32.mrf.mxu0  ;;  %v673_v2 = vpop.f32.mrf.mxu1 }
  0xdd   :  { %1054 = vst [vmem:[%s1752_s3 + $0x38] sm:$0xff] %v990_v63  ;;  %1086 = vst [vmem:[%s1752_s3 + $0x138] sm:$0xff] %v1022_v0  ;;  %v988_v3 = vadd.f32 %v1491_v36, %v545_v1  ;;  %v1020_v4 = vadd.f32 %v1491_v36, %v673_v2 }
  0xde   :  { %v1234_v5 = vpop.f32.mrf.mxu0  ;;  %v1266_v6 = vpop.f32.mrf.mxu1 }
  0xdf   :  { %1052 = vst [vmem:[%s1752_s3 + $0x28] sm:$0xff] %v988_v3  ;;  %1084 = vst [vmem:[%s1752_s3 + $0x128] sm:$0xff] %v1020_v4  ;;  %v993_v7 = vadd.f32 %v1234_v5, %v1491_v36  ;;  %v1025_v8 = vadd.f32 %v1266_v6, %v1491_v36 }
  0xe0   :  { %v558_v9 = vpop.f32.mrf.mxu0  ;;  %v686_v10 = vpop.f32.mrf.mxu1 }
  0xe1   :  { %1057 = vst [vmem:[%s1752_s3 + $0x50] sm:$0xff] %v993_v7  ;;  %1089 = vst [vmem:[%s1752_s3 + $0x150] sm:$0xff] %v1025_v8  ;;  %v991_v11 = vadd.f32 %v1491_v36, %v558_v9  ;;  %v1023_v12 = vadd.f32 %v1491_v36, %v686_v10 }
  0xe2   :  { %v1235_v13 = vpop.f32.mrf.mxu0  ;;  %v1267_v14 = vpop.f32.mrf.mxu1 }
  0xe3   :  { %1055 = vst [vmem:[%s1752_s3 + $0x40] sm:$0xff] %v991_v11  ;;  %1087 = vst [vmem:[%s1752_s3 + $0x140] sm:$0xff] %v1023_v12  ;;  %v994_v15 = vadd.f32 %v1235_v13, %v1491_v36  ;;  %v1026_v16 = vadd.f32 %v1267_v14, %v1491_v36 }
  0xe4   :  { %v561_v17 = vpop.f32.mrf.mxu0  ;;  %v689_v18 = vpop.f32.mrf.mxu1 }
  0xe5   :  { %1058 = vst [vmem:[%s1752_s3 + $0x58] sm:$0xff] %v994_v15  ;;  %1090 = vst [vmem:[%s1752_s3 + $0x158] sm:$0xff] %v1026_v16  ;;  %v992_v19 = vadd.f32 %v1491_v36, %v561_v17  ;;  %v1024_v20 = vadd.f32 %v1491_v36, %v689_v18 }
  0xe6   :  { %v1238_v21 = vpop.f32.mrf.mxu0  ;;  %v1270_v22 = vpop.f32.mrf.mxu1 }
  0xe7   :  { %1056 = vst [vmem:[%s1752_s3 + $0x48] sm:$0xff] %v992_v19  ;;  %1088 = vst [vmem:[%s1752_s3 + $0x148] sm:$0xff] %v1024_v20  ;;  %v997_v23 = vadd.f32 %v1238_v21, %v1491_v36  ;;  %v1029_v24 = vadd.f32 %v1270_v22, %v1491_v36 }
  0xe8   :  { %v574_v25 = vpop.f32.mrf.mxu0  ;;  %v702_v26 = vpop.f32.mrf.mxu1 }
  0xe9   :  { %1061 = vst [vmem:[%s1752_s3 + $0x70] sm:$0xff] %v997_v23  ;;  %1093 = vst [vmem:[%s1752_s3 + $0x170] sm:$0xff] %v1029_v24  ;;  %v995_v27 = vadd.f32 %v1491_v36, %v574_v25  ;;  %v1027_v28 = vadd.f32 %v1491_v36, %v702_v26 }
  0xea   :  { %v1239_v29 = vpop.f32.mrf.mxu0  ;;  %v1271_v30 = vpop.f32.mrf.mxu1 }
  0xeb   :  { %1059 = vst [vmem:[%s1752_s3 + $0x60] sm:$0xff] %v995_v27  ;;  %1091 = vst [vmem:[%s1752_s3 + $0x160] sm:$0xff] %v1027_v28  ;;  %v998_v31 = vadd.f32 %v1239_v29, %v1491_v36  ;;  %v1030_v32 = vadd.f32 %v1271_v30, %v1491_v36 }
  0xec   :  { %v577_v33 = vpop.f32.mrf.mxu0  ;;  %v705_v34 = vpop.f32.mrf.mxu1 }
  0xed   :  { %1062 = vst [vmem:[%s1752_s3 + $0x78] sm:$0xff] %v998_v31  ;;  %1094 = vst [vmem:[%s1752_s3 + $0x178] sm:$0xff] %v1030_v32  ;;  %v996_v35 = vadd.f32 %v1491_v36, %v577_v33  ;;  %v1028_v37 = vadd.f32 %v1491_v36, %v705_v34 }
  0xee   :  { %v1242_v38 = vpop.f32.mrf.mxu0  ;;  %v1274_v39 = vpop.f32.mrf.mxu1 }
  0xef   :  { %1060 = vst [vmem:[%s1752_s3 + $0x68] sm:$0xff] %v996_v35  ;;  %1092 = vst [vmem:[%s1752_s3 + $0x168] sm:$0xff] %v1028_v37  ;;  %v1001_v40 = vadd.f32 %v1242_v38, %v1491_v36  ;;  %v1033_v41 = vadd.f32 %v1274_v39, %v1491_v36 }
  0xf0   :  { %v590_v42 = vpop.f32.mrf.mxu0  ;;  %v718_v43 = vpop.f32.mrf.mxu1 }
  0xf1   :  { %1065 = vst [vmem:[%s1752_s3 + $0x90] sm:$0xff] %v1001_v40  ;;  %1097 = vst [vmem:[%s1752_s3 + $0x190] sm:$0xff] %v1033_v41  ;;  %v999_v44 = vadd.f32 %v1491_v36, %v590_v42  ;;  %v1031_v45 = vadd.f32 %v1491_v36, %v718_v43 }
  0xf2   :  { %v1243_v46 = vpop.f32.mrf.mxu0  ;;  %v1275_v47 = vpop.f32.mrf.mxu1 }
  0xf3   :  { %1063 = vst [vmem:[%s1752_s3 + $0x80] sm:$0xff] %v999_v44  ;;  %1095 = vst [vmem:[%s1752_s3 + $0x180] sm:$0xff] %v1031_v45  ;;  %v1002_v48 = vadd.f32 %v1243_v46, %v1491_v36  ;;  %v1034_v49 = vadd.f32 %v1275_v47, %v1491_v36 }
  0xf4   :  { %v593_v50 = vpop.f32.mrf.mxu0  ;;  %v721_v51 = vpop.f32.mrf.mxu1 }
  0xf5   :  { %1066 = vst [vmem:[%s1752_s3 + $0x98] sm:$0xff] %v1002_v48  ;;  %1098 = vst [vmem:[%s1752_s3 + $0x198] sm:$0xff] %v1034_v49  ;;  %v1000_v52 = vadd.f32 %v1491_v36, %v593_v50  ;;  %v1032_v53 = vadd.f32 %v1491_v36, %v721_v51 }
  0xf6   :  { %v1246_v54 = vpop.f32.mrf.mxu0  ;;  %v1278_v55 = vpop.f32.mrf.mxu1 }
  0xf7   :  { %1064 = vst [vmem:[%s1752_s3 + $0x88] sm:$0xff] %v1000_v52  ;;  %1096 = vst [vmem:[%s1752_s3 + $0x188] sm:$0xff] %v1032_v53  ;;  %v1005_v56 = vadd.f32 %v1246_v54, %v1491_v36  ;;  %v1037_v57 = vadd.f32 %v1278_v55, %v1491_v36 }
  0xf8   :  { %v606_v58 = vpop.f32.mrf.mxu0  ;;  %v734_v59 = vpop.f32.mrf.mxu1 }
  0xf9   :  { %1069 = vst [vmem:[%s1752_s3 + $0xb0] sm:$0xff] %v1005_v56  ;;  %1101 = vst [vmem:[%s1752_s3 + $0x1b0] sm:$0xff] %v1037_v57  ;;  %v1003_v60 = vadd.f32 %v1491_v36, %v606_v58  ;;  %v1035_v61 = vadd.f32 %v1491_v36, %v734_v59 }
  0xfa   :  { %v1247_v62 = vpop.f32.mrf.mxu0  ;;  %v1279_v63 = vpop.f32.mrf.mxu1 }
  0xfb   :  { %1067 = vst [vmem:[%s1752_s3 + $0xa0] sm:$0xff] %v1003_v60  ;;  %1099 = vst [vmem:[%s1752_s3 + $0x1a0] sm:$0xff] %v1035_v61  ;;  %v1006_v0 = vadd.f32 %v1247_v62, %v1491_v36  ;;  %v1038_v1 = vadd.f32 %v1279_v63, %v1491_v36 }
  0xfc   :  { %v609_v2 = vpop.f32.mrf.mxu0  ;;  %v737_v3 = vpop.f32.mrf.mxu1 }
  0xfd   :  { %1070 = vst [vmem:[%s1752_s3 + $0xb8] sm:$0xff] %v1006_v0  ;;  %1102 = vst [vmem:[%s1752_s3 + $0x1b8] sm:$0xff] %v1038_v1  ;;  %v1004_v4 = vadd.f32 %v1491_v36, %v609_v2  ;;  %v1036_v5 = vadd.f32 %v1491_v36, %v737_v3 }
  0xfe   :  { %v1250_v6 = vpop.f32.mrf.mxu0  ;;  %v1282_v7 = vpop.f32.mrf.mxu1 }
  0xff   :  { %1068 = vst [vmem:[%s1752_s3 + $0xa8] sm:$0xff] %v1004_v4  ;;  %1100 = vst [vmem:[%s1752_s3 + $0x1a8] sm:$0xff] %v1036_v5  ;;  %v1009_v8 = vadd.f32 %v1250_v6, %v1491_v36  ;;  %v1041_v9 = vadd.f32 %v1282_v7, %v1491_v36 }
 0x100   :  { %v622_v10 = vpop.f32.mrf.mxu0  ;;  %v750_v11 = vpop.f32.mrf.mxu1 }
 0x101   :  { %1073 = vst [vmem:[%s1752_s3 + $0xd0] sm:$0xff] %v1009_v8  ;;  %1105 = vst [vmem:[%s1752_s3 + $0x1d0] sm:$0xff] %v1041_v9  ;;  %v1007_v12 = vadd.f32 %v1491_v36, %v622_v10  ;;  %v1039_v13 = vadd.f32 %v1491_v36, %v750_v11 }
 0x102   :  { %v1251_v14 = vpop.f32.mrf.mxu0  ;;  %v1283_v15 = vpop.f32.mrf.mxu1 }
 0x103   :  { %1071 = vst [vmem:[%s1752_s3 + $0xc0] sm:$0xff] %v1007_v12  ;;  %1103 = vst [vmem:[%s1752_s3 + $0x1c0] sm:$0xff] %v1039_v13  ;;  %v1010_v16 = vadd.f32 %v1251_v14, %v1491_v36  ;;  %v1042_v17 = vadd.f32 %v1283_v15, %v1491_v36 }
 0x104   :  { %v625_v18 = vpop.f32.mrf.mxu0  ;;  %v753_v19 = vpop.f32.mrf.mxu1 }
 0x105   :  { %1074 = vst [vmem:[%s1752_s3 + $0xd8] sm:$0xff] %v1010_v16  ;;  %1106 = vst [vmem:[%s1752_s3 + $0x1d8] sm:$0xff] %v1042_v17  ;;  %v1008_v20 = vadd.f32 %v1491_v36, %v625_v18  ;;  %v1040_v21 = vadd.f32 %v1491_v36, %v753_v19 }
 0x106   :  { %v1254_v22 = vpop.f32.mrf.mxu0  ;;  %v1286_v23 = vpop.f32.mrf.mxu1 }
 0x107   :  { %1072 = vst [vmem:[%s1752_s3 + $0xc8] sm:$0xff] %v1008_v20  ;;  %1104 = vst [vmem:[%s1752_s3 + $0x1c8] sm:$0xff] %v1040_v21  ;;  %v1013_v24 = vadd.f32 %v1254_v22, %v1491_v36  ;;  %v1045_v25 = vadd.f32 %v1286_v23, %v1491_v36 }
 0x108   :  { %v638_v26 = vpop.f32.mrf.mxu0  ;;  %v766_v27 = vpop.f32.mrf.mxu1 }
 0x109   :  { %1077 = vst [vmem:[%s1752_s3 + $0xf0] sm:$0xff] %v1013_v24  ;;  %1109 = vst [vmem:[%s1752_s3 + $0x1f0] sm:$0xff] %v1045_v25  ;;  %v1011_v28 = vadd.f32 %v1491_v36, %v638_v26  ;;  %v1043_v29 = vadd.f32 %v1491_v36, %v766_v27 }
 0x10a   :  { %v1255_v30 = vpop.f32.mrf.mxu0  ;;  %v1287_v31 = vpop.f32.mrf.mxu1 }
 0x10b   :  { %1075 = vst [vmem:[%s1752_s3 + $0xe0] sm:$0xff] %v1011_v28  ;;  %1107 = vst [vmem:[%s1752_s3 + $0x1e0] sm:$0xff] %v1043_v29  ;;  %v1014_v32 = vadd.f32 %v1255_v30, %v1491_v36  ;;  %v1046_v33 = vadd.f32 %v1287_v31, %v1491_v36 }
 0x10c   :  { %v641_v34 = vpop.f32.mrf.mxu0  ;;  %v769_v35 = vpop.f32.mrf.mxu1 }
 0x10d   :  { %1078 = vst [vmem:[%s1752_s3 + $0xf8] sm:$0xff] %v1014_v32  ;;  %1110 = vst [vmem:[%s1752_s3 + $0x1f8] sm:$0xff] %v1046_v33  ;;  %v1012_v37 = vadd.f32 %v1491_v36, %v641_v34  ;;  %v1044_v38 = vadd.f32 %v1491_v36, %v769_v35 }
 0x10f   :  { %1076 = vst [vmem:[%s1752_s3 + $0xe8] sm:$0xff] %v1012_v37  ;;  %1108 = vst [vmem:[%s1752_s3 + $0x1e8] sm:$0xff] %v1044_v38 }

</bundles_post_ra>
